<compile_context>
chip_gen: v6e
topology: v6e:2x2x1
jax: 0.10.0
libtpu: 0.0.40
codegen_flags: <defaults>
</compile_context>

<pallas_src>
import jax
import jax.numpy as jnp
from jax import lax
from jax.experimental import pallas as pl
from jax.experimental.pallas import tpu as pltpu


def head_attention_kernel(x_ref, wqkv_ref, o_ref):
    """One grid step handles a block of `Bb` batch elements.

    x_ref    : (Bb, T, C)  VMEM, bf16
    wqkv_ref : (C, 3*H)    VMEM, bf16 — pre-transposed, fused [Wq*scale | Wk | Wv]
    o_ref    : (Bb, T*H)   VMEM, f32 — lane-dense output slab
    """
    Bb, T, C = x_ref.shape
    H = wqkv_ref.shape[1] // 3

    # Fused QKV projection: a single (Bb*T, C) @ (C, 3H) MXU push, bf16
    # operands with fp32 accumulation.
    x2 = x_ref[...].reshape(Bb * T, C)
    qkv = jnp.dot(x2, wqkv_ref[...], preferred_element_type=jnp.float32)  # (Bb*T, 3H) f32
    qkv = qkv.reshape(Bb, T, 3 * H)

    # Lane slices at 16-lane (non-128-aligned) offsets: noise at H=16.  If H
    # grows, pad each projection to a 128-lane boundary in wqkv instead so the
    # slices become free vreg selections.
    q = qkv[..., 0:H].astype(jnp.bfloat16)        # (Bb, T, H) — scale already folded in
    k = qkv[..., H:2 * H].astype(jnp.bfloat16)    # (Bb, T, H)
    v = qkv[..., 2 * H:].astype(jnp.bfloat16)     # (Bb, T, H)

    # Scores: contract the head dim of q and k directly (no k.T / XLU
    # transpose).  bf16 operands, f32 accumulation.  The 1/sqrt(H) scale is
    # already folded into the Wq columns of wqkv (wrapper).
    scores = lax.dot_general(
        q, k,
        dimension_numbers=(((2,), (2,)), ((0,), (0,))),
        preferred_element_type=jnp.float32,
    )                                              # (Bb, T, T) f32

    # Causal (lower-triangular) mask.  At T=8 the iota+compare is noise; for
    # large T pass a precomputed resident additive mask (or flash-tile the kv
    # axis) instead to bound the fp32 scores footprint.
    row = lax.broadcasted_iota(jnp.int32, (T, T), 0)
    col = lax.broadcasted_iota(jnp.int32, (T, T), 1)
    scores = jnp.where((col <= row)[None, :, :], scores, -jnp.inf)

    # Numerically-stable softmax kept fully in f32 (v5e VPU/EUP have no bf16);
    # the reciprocal goes to the otherwise-idle EUP slot.
    m = jnp.max(scores, axis=-1, keepdims=True)
    e = jnp.exp(scores - m)
    denom = jnp.sum(e, axis=-1, keepdims=True)
    weights = e * pl.reciprocal(denom, approx=True)       # (Bb, T, T) f32
    # TODO(synk): training-mode dropout on `weights` not implemented (eval mode).

    # Weighted sum of values: (Bb, T, T) x (Bb, T, H) -> (Bb, T, H), bf16
    # operands for the MXU, f32 accumulation.
    out = lax.dot_general(
        weights.astype(jnp.bfloat16), v,
        dimension_numbers=(((2,), (1,)), ((0,), (0,))),
        preferred_element_type=jnp.float32,
    )

    # Lane-dense store: one (Bb, T*H) slab (T*H == 128 here) instead of masked
    # 16-lane partial stores.  Drop this reshape if H >= 128 (it would then be
    # a pure-loss relayout).
    o_ref[...] = out.reshape(Bb, T * H).astype(o_ref.dtype)


def head_forward(x, wq, wk, wv, *, batch_block=None):
    """x: (B, T, C); wq/wk/wv: (head_size, embed_size) (torch.nn.Linear layout).

    Returns (B, T, head_size) in float32, matching `Head.forward` (eval mode).
    """
    B, T, C = x.shape
    H = wq.shape[0]

    # Pre-transpose + fuse the three projection weights once, outside the
    # kernel, and fold the 1/sqrt(H) attention scale into the Wq columns
    # (weight-side constant fold — free under jit).  Cast to bf16 for the MXU.
    scale = 1.0 / (H ** 0.5)
    wqkv = jnp.concatenate([wq.T * scale, wk.T, wv.T], axis=1)   # (C, 3H) f32
    wqkv = wqkv.astype(jnp.bfloat16)
    x_in = x.astype(jnp.bfloat16)

    # Whole batch in one grid step by default: at these shapes the kernel is
    # per-step-overhead / MXU-push-latency bound.  Callers scaling B up should
    # keep Bb*T >= 128 (v5e) / 256 (v6e, v7x) rows per step and re-check the
    # VMEM budget (fp32 scores grow as Bb*T^2; v7x has 64 MiB, half of v6e).
    if batch_block is None:
        batch_block = B
    Bb = min(batch_block, B)
    assert B % Bb == 0, "batch_block must divide B (pad the batch otherwise)"
    grid = (B // Bb,)

    # Only ask for cross-core sharding when there is more than one step; for a
    # single tiny step, splitting across v7x's two TensorCores is pure overhead.
    dim_sem = ("parallel",) if grid[0] > 1 else ("arbitrary",)

    out_flat = pl.pallas_call(
        head_attention_kernel,
        out_shape=jax.ShapeDtypeStruct((B, T * H), jnp.float32),
        grid_spec=pltpu.PrefetchScalarGridSpec(
            num_scalar_prefetch=0,
            grid=grid,
            in_specs=[
                pl.BlockSpec((Bb, T, C), lambda b: (b, 0, 0)),      # batch block of x
                pl.BlockSpec((C, 3 * H), lambda b: (0, 0)),         # fused weights, resident
            ],
            out_specs=pl.BlockSpec((Bb, T * H), lambda b: (b, 0)),  # lane-dense slab
        ),
        compiler_params=pltpu.CompilerParams(
            dimension_semantics=dim_sem,
        ),
    )(x_in, wqkv)

    return out_flat.reshape(B, T, H)


def reference_forward(x, wq, wk, wv):
    """Pure-JAX fp32 reference matching the PyTorch forward (eval mode)."""
    B, T, C = x.shape
    H = wq.shape[0]
    q = x @ wq.T
    k = x @ wk.T
    v = x @ wv.T
    w = (q @ jnp.swapaxes(k, -2, -1)) / (H ** 0.5)
    mask = jnp.tril(jnp.ones((T, T)))
    w = jnp.where(mask == 0, -jnp.inf, w)
    w = jax.nn.softmax(w, axis=-1)
    return w @ v


if __name__ == "__main__":
    # Small shapes consistent with the module: batch=2, seq(block_size)=8,
    # embed_size=32, head_size=16  (so T*H = 128, a full lane row).
    B, T, C, H = 2, 8, 32, 16

    key = jax.random.PRNGKey(0)
    kx, kq, kk, kv = jax.random.split(key, 4)

    x = jax.random.normal(kx, (B, T, C), dtype=jnp.float32)
    # "Linear(embed_size, head_size, bias=False)" weights, shaped
    # (head_size, embed_size) as in torch.nn.Linear.
    bound = 1.0 / (C ** 0.5)
    wq = jax.random.uniform(kq, (H, C), minval=-bound, maxval=bound, dtype=jnp.float32)
    wk = jax.random.uniform(kk, (H, C), minval=-bound, maxval=bound, dtype=jnp.float32)
    wv = jax.random.uniform(kv, (H, C), minval=-bound, maxval=bound, dtype=jnp.float32)

    out = head_forward(x, wq, wk, wv)
    out = jax.block_until_ready(out)

    ref = reference_forward(x, wq, wk, wv)
    assert out.shape == (B, T, H)
    # Tolerance relaxed vs exact fp32 because the matmul operands are bf16
    # (f32 accumulation) and the softmax denominator uses the EUP approximate
    # reciprocal (pl.reciprocal(approx=True)).
    assert jnp.allclose(out, ref, atol=3e-2, rtol=3e-2), "mismatch vs reference"

    print("KERNEL_OK")
</pallas_src>

<mosaic_0001>
module attributes {stable_mosaic.version = 11 : i64} {
  func.func @head_attention_kernel(%arg0: i32, %arg1: memref<2x8x32xbf16, #tpu.memory_space<vmem>>, %arg2: memref<32x48xbf16, #tpu.memory_space<vmem>>, %arg3: memref<2x128xf32, #tpu.memory_space<vmem>>) attributes {dimension_semantics = [#tpu.dimension_semantics<arbitrary>], iteration_bounds = array<i64: 1>, scalar_prefetch = 0 : i64, scratch_operands = 0 : i64, tpu.core_type = #tpu.core_type<tc>, window_params = [{transform_indices = @transform_0, window_bounds = array<i64: 2, 8, 32>}, {pipeline_mode = #tpu.pipeline_mode<synchronous>, transform_indices = @transform_1, window_bounds = array<i64: 32, 48>}, {transform_indices = @transform_2, window_bounds = array<i64: 2, 128>}]} {
    %c0 = arith.constant 0 : index
    %c0_0 = arith.constant 0 : index
    %c0_1 = arith.constant 0 : index
    %0 = vector.load %arg1[%c0, %c0_0, %c0_1] : memref<2x8x32xbf16, #tpu.memory_space<vmem>>, vector<2x8x32xbf16>
    %1 = vector.shape_cast %0 : vector<2x8x32xbf16> to vector<16x32xbf16>
    %c0_2 = arith.constant 0 : index
    %c0_3 = arith.constant 0 : index
    %2 = vector.load %arg2[%c0_2, %c0_3] : memref<32x48xbf16, #tpu.memory_space<vmem>>, vector<32x48xbf16>
    %cst = arith.constant dense<0.000000e+00> : vector<16x48xf32>
    %3 = tpu.matmul %1, %2, %cst {dimension_numbers = #tpu.dot_dimension_numbers<[1], [0], [0], [1], [0, 0, 1, 1], [], []>} : vector<16x32xbf16>, vector<32x48xbf16>, vector<16x48xf32> -> vector<16x48xf32>
    %4 = vector.shape_cast %3 : vector<16x48xf32> to vector<2x8x48xf32>
    %5 = vector.extract_strided_slice %4 {offsets = [0, 0, 0], sizes = [2, 8, 16], strides = [1, 1, 1]} : vector<2x8x48xf32> to vector<2x8x16xf32>
    %6 = arith.truncf %5 : vector<2x8x16xf32> to vector<2x8x16xbf16>
    %7 = vector.extract_strided_slice %4 {offsets = [0, 0, 16], sizes = [2, 8, 16], strides = [1, 1, 1]} : vector<2x8x48xf32> to vector<2x8x16xf32>
    %8 = arith.truncf %7 : vector<2x8x16xf32> to vector<2x8x16xbf16>
    %9 = vector.extract_strided_slice %4 {offsets = [0, 0, 32], sizes = [2, 8, 16], strides = [1, 1, 1]} : vector<2x8x48xf32> to vector<2x8x16xf32>
    %10 = arith.truncf %9 : vector<2x8x16xf32> to vector<2x8x16xbf16>
    %cst_4 = arith.constant dense<0.000000e+00> : vector<2x8x8xf32>
    %11 = tpu.matmul %6, %8, %cst_4 {dimension_numbers = #tpu.dot_dimension_numbers<[2], [2], [1], [1], [0, 0, 0, 1, 1, 1], [0], [0]>} : vector<2x8x16xbf16>, vector<2x8x16xbf16>, vector<2x8x8xf32> -> vector<2x8x8xf32>
    %12 = tpu.iota {dimensions = array<i32: 0>} : vector<8x8xi32>
    %13 = tpu.iota {dimensions = array<i32: 1>} : vector<8x8xi32>
    %14 = arith.cmpi sle, %13, %12 : vector<8x8xi32>
    %15 = vector.shape_cast %14 : vector<8x8xi1> to vector<1x8x8xi1>
    %cst_5 = arith.constant 0xFF800000 : f32
    %16 = vector.shape_cast %15 : vector<1x8x8xi1> to vector<1x8x8xi1>
    %17 = vector.broadcast %16 : vector<1x8x8xi1> to vector<2x8x8xi1>
    %18 = vector.broadcast %cst_5 : f32 to vector<2x8x8xf32>
    %19 = arith.select %17, %11, %18 : vector<2x8x8xi1>, vector<2x8x8xf32>
    %cst_6 = arith.constant dense<0xFF800000> : vector<2x8xf32>
    %20 = vector.multi_reduction <maximumf>, %19, %cst_6 [2] : vector<2x8x8xf32> to vector<2x8xf32>
    %21 = vector.shape_cast %20 : vector<2x8xf32> to vector<2x8x1xf32>
    %22 = vector.broadcast %21 : vector<2x8x1xf32> to vector<2x8x8xf32>
    %23 = arith.subf %19, %22 : vector<2x8x8xf32>
    %24 = math.exp %23 : vector<2x8x8xf32>
    %cst_7 = arith.constant dense<0.000000e+00> : vector<2x8xf32>
    %25 = vector.multi_reduction <add>, %24, %cst_7 [2] : vector<2x8x8xf32> to vector<2x8xf32>
    %26 = vector.shape_cast %25 : vector<2x8xf32> to vector<2x8x1xf32>
    %27 = tpu.reciprocal %26 {approx = true} : vector<2x8x1xf32> -> vector<2x8x1xf32>
    %28 = vector.broadcast %27 : vector<2x8x1xf32> to vector<2x8x8xf32>
    %29 = arith.mulf %24, %28 : vector<2x8x8xf32>
    %30 = arith.truncf %29 : vector<2x8x8xf32> to vector<2x8x8xbf16>
    %cst_8 = arith.constant dense<0.000000e+00> : vector<2x8x16xf32>
    %31 = tpu.matmul %30, %10, %cst_8 {dimension_numbers = #tpu.dot_dimension_numbers<[2], [1], [1], [2], [0, 0, 0, 1, 1, 2], [0], [0]>} : vector<2x8x8xbf16>, vector<2x8x16xbf16>, vector<2x8x16xf32> -> vector<2x8x16xf32>
    %32 = vector.shape_cast %31 : vector<2x8x16xf32> to vector<2x128xf32>
    %c0_9 = arith.constant 0 : index
    %c0_10 = arith.constant 0 : index
    %33 = vector.load %arg3[%c0_9, %c0_10] : memref<2x128xf32, #tpu.memory_space<vmem>>, vector<2x128xf32>
    tpu.vector_store %arg3[%c0_9, %c0_10], %32 {strides = array<i32>} : memref<2x128xf32, #tpu.memory_space<vmem>>, vector<2x128xf32>,
    return
  }
  func.func @transform_0(%arg0: i32) -> (i32, i32, i32) {
    %c0_i32 = arith.constant 0 : i32
    %c0_i32_0 = arith.constant 0 : i32
    %c0_i32_1 = arith.constant 0 : i32
    return %arg0, %c0_i32, %c0_i32_0 : i32, i32, i32
  }
  func.func @transform_1(%arg0: i32) -> (i32, i32) {
    %c0_i32 = arith.constant 0 : i32
    %c0_i32_0 = arith.constant 0 : i32
    %c0_i32_1 = arith.constant 0 : i32
    return %c0_i32, %c0_i32_0 : i32, i32
  }
  func.func @transform_2(%arg0: i32) -> (i32, i32) {
    %c0_i32 = arith.constant 0 : i32
    %c0_i32_0 = arith.constant 0 : i32
    return %arg0, %c0_i32 : i32, i32
  }
}

</mosaic_0001>

<bundles_post_ra>
// kernel: tpu_custom_call.1
= control target key start
LH: loop header
LB: loop body
LE: loop exit
PB: predicated region body
PF: predicated region fallthrough
CT: control target
= control target key end

     0   :  { %7 = vsyncpa [#allocation3], 0  ;;  %s699_s0 = inlined_call_operand.hbm [shape: bf16[2,8,32], index: 0, kind: input, shape index: {}]   ;;  %s700_s1 = inlined_call_operand.hbm [shape: bf16[32,48], index: 1, kind: input, shape index: {}]   ;;  %s701_s2 = inlined_call_operand.hbm [shape: f32[2,128], index: 2, kind: output, shape index: {}]  }
   0x1   :  { %8 = vsyncpa [#allocation6], 0 }
   0x2   :  { %9 = vsyncpa [#allocation4], 0  ;;  %s607_s9 = smov [#allocation2]  }
   0x3   :  { %s15_s10 = sshll.u32 %s607_s9, 4  ;;  %s16_s10 = int_to_ptr.vmem [resolvable:$true] %s15_s10 }
   0x4   :  { %s549_s11 = scalar_lea.vmem %s16_s10, 128  ;;  %p554_p1 = scmp.lt.s32.totalorder %s16_s10, %s16_s10 }
   0x5   :  { %p550_p0 = scmp.ne.s32.totalorder %s16_s10, %s549_s11  ;;  %p555_p2 = scmp.lt.s32.totalorder %s549_s11, %s549_s11 }
   0x7   :  { %p556_p3 = por %p555_p2, %p554_p1 }
   0x9   :  { %p557_p4 = pnand %p556_p3, %p550_p0 }
   0xb   :  { %560 = shalt.err (!%p557_p4)
}
   0xc   :  { %s608_s12 = smov 64   ;;  %s609_s13 = smov 4  }
   0xd   :  { %21 = dma.hbm_to_vmem [thread:$0]  %s699_s0, 128, %s16_s10, [#allocation3], %s608_s12, %s608_s12, %s609_s13  }
   0xe   :  { %s610_s16 = smov [#allocation5]  }
   0xf   :  { %s27_s17 = sshll.u32 %s610_s16, 4  ;;  %s28_s17 = int_to_ptr.vmem [resolvable:$true] %s27_s17 }
  0x10   :  { %s569_s18 = scalar_lea.vmem %s28_s17, 256  ;;  %p574_p6 = scmp.lt.s32.totalorder %s28_s17, %s28_s17 }
  0x11   :  { %p570_p5 = scmp.ne.s32.totalorder %s28_s17, %s569_s18  ;;  %p575_p7 = scmp.lt.s32.totalorder %s569_s18, %s569_s18 }
  0x13   :  { %p576_p8 = por %p575_p7, %p574_p6 }
  0x15   :  { %p577_p9 = pnand %p576_p8, %p570_p5 }
  0x17   :  { %580 = shalt.err (!%p577_p9)
}
  0x18   :  { %33 = dma.hbm_to_vmem [thread:$0]  %s700_s1, 256, %s28_s17, [#allocation6], %s608_s12, %s608_s12, %s609_s13  }
  0x19   :  { %601 = dma.done.wait [#allocation3], 128  }
  0x1a   :  { %602 = vsyncadd [#allocation3], 4294967168 }
  0x1b   :  { %603 = dma.done.wait [#allocation6], 256  }
  0x1c   :  { %604 = vsyncadd [#allocation6], 4294967040  ;;  %v611_v0 = vmov 0.0   ;;  %vm612_vm0 = vmmov 0   ;;  %v530_v1 = vld [vmem:[#allocation5 + $0x8] sm:$0xff]   ;;  %v531_v2 = vld [vmem:[#allocation5] sm:$0xff]   ;;  %v210_v14 = vlaneseq }
  0x1d   :  { %483 = vmatprep.subr.bf16.mxu0 %v611_v0  ;;  %487 = vmatprep.mubr.msk.bf16.mxu0 %vm612_vm0, %v611_v0  ;;  %v532_v3 = vld [vmem:[#allocation2] sm:$0xff]   ;;  %vm64_vm1 = vcmask 261120   ;;  %s613_s0 = smov 112   ;;  %vm114_vm2 = vcmask 130048   ;;  %vm219_vm4 = vcmask 64512   ;;  %s614_s1 = smov 96  }
  0x1e   :  { %491 = vmatprep.subr.bf16.mxu1 %v611_v0  ;;  %493 = vmatprep.mubr.msk.bf16.mxu1 %vm612_vm0, %v611_v0  ;;  %v670_v15 = vshrl.u32 %v210_v14, 7  ;;  %v213_v16 = vand.u32 127, %v210_v14  ;;  %vm249_vm5 = vcmask 1043456   ;;  %v615_v51 = vmov 1983009808   ;;  %s617_s21 = smov 32  }
  0x1f   :  { %484 = vmatpush3.bf16.msra.mxu0 %v530_v1  ;;  %v343_v52 = vunpack.c.l.s4 %v615_v51  ;;  %v616_v53 = vmov 1934713408   ;;  %s618_s22 = smov 48   ;;  %s619_s23 = smov 16   ;;  %vm437_vm6 = vcmask 392192   ;;  %vm439_vm7 = vcmask 523264  }
  0x20   :  { %485 = vmatprep.subr.bf16.mxu0 %v611_v0  ;;  %vm214_vm3 = vcmp.le.s32.totalorder %v213_v16, %v670_v15  ;;  %v374_v54 = vunpack.c.l.s4 %v616_v53  ;;  %s620_s24 = smov 80   ;;  %vm441_vm8 = vcmask 654336   ;;  %vm443_vm9 = vcmask 785408   ;;  %s621_s25 = smov [#allocation7]  }
  0x21   :  { %v344_v55 = vunpack.c.0.s8 %v343_v52  ;;  %s454_s26 = sshll.u32 %s621_s25, 4  ;;  %vm445_vm10 = vcmask 916480   ;;  %s455_s26 = int_to_ptr.vmem [resolvable:$true] %s454_s26 }
  0x22   :  { %v375_v57 = vunpack.c.0.s8 %v374_v54  ;;  %s581_s27 = scalar_lea.vmem %s455_s26, 32  ;;  %p586_p11 = scmp.lt.s32.totalorder %s455_s26, %s455_s26 }
  0x23   :  { %486 = vmatpush3.bf16.msra.mxu0 %v531_v2  ;;  %v347_v58 = vsub.s32 %v344_v55, %v670_v15  ;;  %p582_p10 = scmp.ne.s32.totalorder %s455_s26, %s581_s27  ;;  %p587_p12 = scmp.lt.s32.totalorder %s581_s27, %s581_s27 }
  0x24   :  { %497 = vmatprep.subr.bf16.mxu0 %v611_v0  ;;  %v378_v62 = vsub.s32 %v375_v57, %v670_v15 }
  0x25   :  { %p588_p13 = por %p587_p12, %p586_p11 }
  0x26   :  { %488 = vmatmul.mubr.msk.bf16.vlgmr.msra.gmra.mxu0 %vm64_vm1, %v532_v3 }
  0x27   :  { %499 = vmatprep.mubr.msk.bf16.mxu0 %vm612_vm0, %v611_v0  ;;  %p589_p0 = pnand %p588_p13, %p582_p10 }
  0xe6   :  { %v102_v4 = vpop.f32.mrf.mxu0 }
  0xe7   :  { %v109_v5 = vpack.c.bf16 %v102_v4, %v102_v4 }
  0xe8   :  { %v489_v6 = vpop.f32.mrf.mxu0 }
  0xe9   :  { %112 = vrot.lane.b32.xlu0 %v109_v5, %s613_s0 }
  0xea   :  { %v105_v7 = vpop.f32.mrf.mxu0 }
  0xeb   :  { %v110_v8 = vpack.c.bf16 %v105_v7, %v105_v7 }
  0xec   :  { %v490_v9 = vpop.f32.mrf.mxu0 }
  0xed   :  { %162 = vrot.lane.b32.xlu0 %v110_v8, %s613_s0 }
 0x15b   :  { %v113_v10 = vpop.permute.xlu0 %112 }
 0x15c   :  { %v119_v11 = vsel %vm114_vm2, %v113_v10, 0 }
 0x15d   :  { %492 = vmatpush3.bf16.xpose.msra.mxu1 %v119_v11 }
 0x15e   :  { %503 = vmatprep.subr.bf16.mxu1 %v611_v0 }
 0x15f   :  { %v163_v12 = vpop.permute.xlu0 %162 }
 0x160   :  { %v168_v13 = vsel %vm114_vm2, %v163_v12, 0 }
 0x161   :  { %498 = vmatpush3.bf16.xpose.msra.mxu0 %v168_v13 }
 0x162   :  { %509 = vmatprep.subr.bf16.mxu0 %v611_v0 }
 0x164   :  { %494 = vmatmul.mubr.msk.bf16.vlgmr.msra.gmra.mxu1 %vm114_vm2, %v109_v5 }
 0x165   :  { %505 = vmatprep.mubr.msk.bf16.mxu1 %vm612_vm0, %v611_v0 }
 0x168   :  { %500 = vmatmul.mubr.msk.bf16.vlgmr.msra.gmra.mxu0 %vm114_vm2, %v110_v8 }
 0x169   :  { %511 = vmatprep.mubr.msk.bf16.mxu0 %vm612_vm0, %v611_v0 }
 0x224   :  { %v155_v17 = vpop.f32.mrf.mxu1 }
 0x225   :  { %v217_v18 = vsel %vm214_vm3, %v155_v17, -inf }
 0x226   :  { %v495_v19 = vpop.f32.mrf.mxu1  ;;  %v220_v20 = vsel %vm219_vm4, %v217_v18, -inf }
 0x227   :  { %221 = vmax.xlane.f32.xlu1 %v220_v20 }
 0x228   :  { %v158_v21 = vpop.f32.mrf.mxu1  ;;  %v204_v22 = vpop.f32.mrf.mxu0 }
 0x229   :  { %v218_v23 = vsel %vm214_vm3, %v204_v22, -inf }
 0x22a   :  { %v496_v24 = vpop.f32.mrf.mxu1  ;;  %v501_v25 = vpop.f32.mrf.mxu0  ;;  %v223_v26 = vsel %vm219_vm4, %v218_v23, -inf }
 0x22b   :  { %224 = vmax.xlane.f32.xlu1 %v223_v26 }
 0x22c   :  { %v207_v27 = vpop.f32.mrf.mxu0 }
 0x22e   :  { %v502_v28 = vpop.f32.mrf.mxu0 }
 0x23c   :  { %244 = vrot.lane.b32.xlu1 %v109_v5, %s614_s1 }
 0x2b0   :  { %v222_v29 = vpop.xlane.xlu1 %221 }
 0x2b1   :  { %v226_v30 = vsub.f32 %v217_v18, %v222_v29 }
 0x2b3   :  { %v228_v31 = vmul.f32 1.442695, %v226_v30 }
 0x2b4   :  { %v225_v32 = vpop.xlane.xlu1 %224 }
 0x2b5   :  { %533 = vpow2.f32 %v228_v31  ;;  %v227_v33 = vsub.f32 %v218_v23, %v225_v32 }
 0x2b7   :  { %v230_v34 = vmul.f32 1.442695, %v227_v33 }
 0x2b8   :  { %v245_v35 = vpop.permute.xlu1 %244 }
 0x2b9   :  { %535 = vpow2.f32 %v230_v34  ;;  %v251_v36 = vsel %vm249_vm5, %v245_v35, 0 }
 0x2ba   :  { %504 = vmatpush3.bf16.msra.mxu1 %v251_v36 }
 0x2c2   :  { %v534_v37 = vpop.eup %533 }
 0x2c3   :  { %v232_v38 = vsel %vm219_vm4, %v534_v37, 0.0 }
 0x2c4   :  { %233 = vadd.xlane.f32.xlu0 %v232_v38 }
 0x2c6   :  { %v536_v39 = vpop.eup %535 }
 0x2c7   :  { %v235_v40 = vsel %vm219_vm4, %v536_v39, 0.0 }
 0x2c8   :  { %236 = vadd.xlane.f32.xlu1 %v235_v40 }
 0x2d9   :  { %293 = vrot.lane.b32.xlu1 %v110_v8, %s614_s1 }
 0x34d   :  { %v234_v41 = vpop.xlane.xlu0 %233 }
 0x34e   :  { %537 = vrcp.f32 %v234_v41 }
 0x351   :  { %v237_v42 = vpop.xlane.xlu1 %236 }
 0x352   :  { %539 = vrcp.f32 %v237_v42 }
 0x355   :  { %v294_v43 = vpop.permute.xlu1 %293 }
 0x356   :  { %v299_v44 = vsel %vm249_vm5, %v294_v43, 0 }
 0x357   :  { %510 = vmatpush3.bf16.msra.mxu0 %v299_v44 }
 0x35b   :  { %v538_v45 = vpop.eup %537 }
 0x35c   :  { %v240_v46 = vmul.f32 %v538_v45, %v534_v37 }
 0x35e   :  { %v242_v47 = vpack.c.bf16 %v240_v46, %v240_v46 }
 0x35f   :  { %v540_v48 = vpop.eup %539 }
 0x360   :  { %506 = vmatmul.mubr.msk.bf16.vlgmr.msra.gmra.mxu1 %vm219_vm4, %v242_v47  ;;  %v241_v49 = vmul.f32 %v540_v48, %v536_v39 }
 0x362   :  { %v243_v50 = vpack.c.bf16 %v241_v49, %v241_v49 }
 0x364   :  { %512 = vmatmul.mubr.msk.bf16.vlgmr.msra.gmra.mxu0 %vm219_vm4, %v243_v50 }
 0x420   :  { %v287_v56 = vpop.f32.mrf.mxu1 }
 0x421   :  { %v348_v63 = vrot.slane %v287_v56, %v347_v58  ;;  %v341_v5 = vcombine.high %v287_v56, %v611_v0 }
 0x422   :  { %v507_v59 = vpop.f32.mrf.mxu1 }
 0x423   :  { %v355_v13 = vrot.slane %v341_v5, %v347_v58 }
 0x424   :  { %v290_v60 = vpop.f32.mrf.mxu1  ;;  %v335_v61 = vpop.f32.mrf.mxu0 }
 0x425   :  { %v356_v1 = vcombine.high %v335_v61, %v611_v0  ;;  %v363_v2 = vrot.slane %v335_v61, %v347_v58 }
 0x426   :  { %v508_v3 = vpop.f32.mrf.mxu1  ;;  %v513_v4 = vpop.f32.mrf.mxu0 }
 0x427   :  { %v371_v6 = vcombine.low %v348_v63, %v363_v2  ;;  %v372_v7 = vcombine.high %v348_v63, %v363_v2  ;;  %v370_v9 = vrot.slane %v356_v1, %v347_v58 }
 0x428   :  { %v338_v8 = vpop.f32.mrf.mxu0 }
 0x429   :  { %v379_v10 = vrot.slane %v371_v6, %v378_v62  ;;  %v386_v11 = vrot.slane %v372_v7, %v378_v62  ;;  %v387_v16 = vcombine.low %v355_v13, %v370_v9  ;;  %v388_v17 = vcombine.high %v355_v13, %v370_v9 }
 0x42a   :  { %v514_v12 = vpop.f32.mrf.mxu0 }
 0x42b   :  { %412 = vrot.lane.b32.xlu1 %v386_v11, %s617_s21  ;;  %v404_v14 = vcombine.high %v386_v11, %v611_v0  ;;  %v403_v15 = vcombine.high %v379_v10, %v611_v0  ;;  %v395_v18 = vrot.slane %v387_v16, %v378_v62  ;;  %v402_v19 = vrot.slane %v388_v17, %v378_v62 }
 0x42d   :  { %416 = vrot.lane.b32.xlu0 %v404_v14, %s618_s22  ;;  %v405_v20 = vcombine.high %v395_v18, %v611_v0  ;;  %v406_v21 = vcombine.high %v402_v19, %v611_v0 }
 0x42f   :  { %408 = vrot.lane.b32.xlu1 %v403_v15, %s619_s23 }
 0x433   :  { %420 = vrot.lane.b32.xlu1 %v395_v18, %s608_s12 }
 0x437   :  { %428 = vrot.lane.b32.xlu1 %v402_v19, %s614_s1 }
 0x43b   :  { %424 = vrot.lane.b32.xlu1 %v405_v20, %s620_s24 }
 0x43f   :  { %432 = vrot.lane.b32.xlu1 %v406_v21, %s613_s0 }
 0x49d   :  { %v413_v22 = vpop.permute.xlu1 %412 }
 0x49f   :  { %v417_v27 = vpop.permute.xlu0 %416 }
 0x4a1   :  { %v409_v23 = vpop.permute.xlu1 %408 }
 0x4a2   :  { %v435_v24 = vsel %vm114_vm2, %v379_v10, %v409_v23 }
 0x4a3   :  { %v436_v26 = vsel %vm64_vm1, %v435_v24, %v413_v22 }
 0x4a4   :  { %v438_v29 = vsel %vm437_vm6, %v436_v26, %v417_v27 }
 0x4a5   :  { %v421_v25 = vpop.permute.xlu1 %420 }
 0x4a6   :  { %v440_v30 = vsel %vm439_vm7, %v438_v29, %v421_v25 }
 0x4a9   :  { %v429_v28 = vpop.permute.xlu1 %428 }
 0x4ad   :  { %v425_v31 = vpop.permute.xlu1 %424 }
 0x4ae   :  { %v442_v32 = vsel %vm441_vm8, %v440_v30, %v425_v31 }
 0x4af   :  { %v444_v0 = vsel %vm443_vm9, %v442_v32, %v429_v28 }
 0x4b1   :  { %v433_v33 = vpop.permute.xlu1 %432 }
 0x4b2   :  { %v446_v34 = vsel %vm445_vm10, %v444_v0, %v433_v33 }
 0x4b3   :  { %447 = vst [vmem:[#allocation7] sm:$0x3] %v446_v34 }
 0x4b4   :  { %592 = shalt.err (!%p589_p0)
}
 0x4b5   :  { %457 = dma.vmem_to_hbm [thread:$0]  %s455_s26, 32, %s701_s2, [#allocation4]  }
 0x4b6   :  { %605 = dma.done.wait [#allocation4], 32  }
 0x4b7   :  { %606 = vsyncadd [#allocation4], 4294967264 }
 0x4b8   :  { %461 = vsyncpa [#allocation3], 1 }
 0x4b9   :  { %462 = vsyncpa [#allocation6], 1 }
 0x4ba   :  { %463 = vsyncpa [#allocation4], 1 }

</bundles_post_ra>
